<compile_context>
chip_gen: v5e
topology: v5e:2x2
jax: 0.10.0
libtpu: 0.0.40
codegen_flags: <defaults>
</compile_context>

<pallas_src>
import math
import jax
import jax.numpy as jnp
from jax.experimental import pallas as pl
from jax.experimental.pallas import tpu as pltpu


def _bcast_add_kernel(a_ref, b_ref, out_ref):
    # a_ref:   (BB, TM, 1)   row term   (matrix_1 . w1 + bias)
    # b_ref:   (BB, 1,  TN)  column term (matrix_2 . w2), lane-major
    # out_ref: (BB, TM, TN)
    out_ref[...] = (a_ref[...] + b_ref[...]).astype(out_ref.dtype)


def _round_up(x, m):
    return ((x + m - 1) // m) * m


def _choose_tiles(B, S1, S2, block_budget_bytes=4 * 1024 * 1024):
    """Pick (BB, TM, TN) for the (BB, TM, TN) output block."""
    budget = block_budget_bytes // 4  # f32 elements per output block

    # Lane dim: prefer the full row whenever a minimal 8-row block fits the
    # budget (best writeback DMA shape, no j axis); otherwise a multiple-of-128
    # chunk strictly smaller than S2 (standard masked boundary block).
    if 8 * S2 <= budget:
        tn = S2
    else:
        tn = min((S2 // 128) * 128, max(128, ((budget // 8) // 128) * 128))

    # Sublane dim: as large as fits, capped at 512.  Result is either the full
    # S1 or a multiple of 8, so the (8,128) block constraint is satisfied.
    tm = min(S1, 512, max(8, ((budget // tn) // 8) * 8))

    # Batch sub-block: only useful when one TM block already covers all of S1
    # (amortizes the ~0.35 us/step overhead for small-S1 shapes).
    bb = 1
    if tm == S1:
        bb = max(1, min(B, budget // max(1, tm * tn)))
    return bb, tm, tn


def linear_matrix_attention(matrix_1, matrix_2, weight_vector, bias):
    """matrix_1: (B, S1, D1), matrix_2: (B, S2, D2),
    weight_vector: (D1 + D2,), bias: scalar () -> (B, S1, S2) float32."""
    B, S1, D1 = matrix_1.shape
    B2, S2, D2 = matrix_2.shape
    assert B == B2
    assert weight_vector.shape == (D1 + D2,)

    w1 = weight_vector[:D1]
    w2 = weight_vector[D1:]

    # Hoisted prologue (tiny, O(B*S*D)): row/column projections in f32, bias
    # folded into the row term so the kernel is a pure broadcast add.
    a = jnp.einsum("bid,d->bi", matrix_1, w1,
                   preferred_element_type=jnp.float32) + bias.astype(jnp.float32)
    b = jnp.einsum("bjd,d->bj", matrix_2, w2,
                   preferred_element_type=jnp.float32)
    a = a.reshape(B, S1, 1)   # sublane-major row term
    b = b.reshape(B, 1, S2)   # lane-major column term (no in-kernel transpose)

    BB, TM, TN = _choose_tiles(B, S1, S2)

    def grid_of(bb, tm, tn):
        return (pl.cdiv(B, bb), pl.cdiv(S1, tm), pl.cdiv(S2, tn))

    grid = grid_of(BB, TM, TN)
    # v7x megacore: keep at least one parallel axis with extent >= 2 whenever
    # the shape allows it (no effect on single-TC v5e/v6e).
    if all(g == 1 for g in grid):
        if S1 >= 16:
            TM = _round_up(pl.cdiv(S1, 2), 8)
        elif S2 >= 256:
            TN = _round_up(pl.cdiv(S2, 2), 128)
        grid = grid_of(BB, TM, TN)

    grid_spec = pltpu.PrefetchScalarGridSpec(
        num_scalar_prefetch=0,
        grid=grid,
        in_specs=[
            pl.BlockSpec((BB, TM, 1), lambda bb, i, j: (bb, i, 0)),
            pl.BlockSpec((BB, 1, TN), lambda bb, i, j: (bb, 0, j)),
        ],
        out_specs=pl.BlockSpec((BB, TM, TN), lambda bb, i, j: (bb, i, j)),
    )

    cost = pl.CostEstimate(
        flops=B * S1 * S2,
        transcendentals=0,
        bytes_accessed=4 * (B * S1 * S2 + B * S1 + B * S2),
    )

    # TODO(synk): if these scores immediately feed masking/softmax, fuse this
    # broadcast into that consumer instead of materializing (B,S1,S2) in HBM;
    # a bf16 out_shape is also a ~2x write-bandwidth win if downstream allows.
    return pl.pallas_call(
        _bcast_add_kernel,
        out_shape=jax.ShapeDtypeStruct((B, S1, S2), jnp.float32),
        grid_spec=grid_spec,
        compiler_params=pltpu.CompilerParams(
            # Every grid point writes a distinct output tile -> fully parallel;
            # lets the v7x runtime shard tiles across both TensorCores.
            dimension_semantics=("parallel", "parallel", "parallel"),
            vmem_limit_bytes=32 * 1024 * 1024,
        ),
        cost_estimate=cost,
    )(a, b)


def reference(matrix_1, matrix_2, weight_vector, bias):
    D1 = matrix_1.shape[-1]
    w1 = weight_vector[:D1]
    w2 = weight_vector[D1:]
    a = jnp.einsum("bid,d->bi", matrix_1, w1)[:, :, None]
    b = jnp.einsum("bjd,d->bj", matrix_2, w2)[:, None, :]
    return a + b + bias


def _run_case(key, B, S1, S2, D1, D2):
    combined_dim = D1 + D2  # combination = 'x,y'
    k1, k2, k3 = jax.random.split(key, 3)
    matrix_1 = jax.random.normal(k1, (B, S1, D1), dtype=jnp.float32)
    matrix_2 = jax.random.normal(k2, (B, S2, D2), dtype=jnp.float32)
    # Deterministic parameter init matching reset_parameters():
    #   weight ~ U(-std, std), std = sqrt(6 / (combined_dim + 1)); bias = 0.
    std = math.sqrt(6.0 / (combined_dim + 1))
    weight_vector = jax.random.uniform(
        k3, (combined_dim,), minval=-std, maxval=std, dtype=jnp.float32)
    bias = jnp.zeros((), dtype=jnp.float32)

    out = linear_matrix_attention(matrix_1, matrix_2, weight_vector, bias)
    out = jax.block_until_ready(out)
    ref = reference(matrix_1, matrix_2, weight_vector, bias)
    assert out.shape == (B, S1, S2)
    assert jnp.allclose(out, ref, atol=1e-5, rtol=1e-5), "mismatch vs reference"


if __name__ == "__main__":
    key = jax.random.PRNGKey(0)
    k_small, k_ragged, k_tiled = jax.random.split(key, 3)

    # Small shapes consistent with the module's forward (single batched block,
    # masked tail stores -- correctness path).
    _run_case(k_small, B=2, S1=8, S2=8, D1=32, D2=32)

    # Ragged dims: exercises cdiv boundary masking + the >=2 parallel-axis split.
    _run_case(k_ragged, B=2, S1=100, S2=600, D1=48, D2=32)

    # Larger shape: exercises the full-row TN, TM=512 tiled path.
    _run_case(k_tiled, B=1, S1=1024, S2=2048, D1=64, D2=64)

    print("KERNEL_OK")
</pallas_src>

<mosaic_0001>
module attributes {stable_mosaic.version = 11 : i64} {
  func.func @_bcast_add_kernel(%arg0: i32, %arg1: i32, %arg2: i32, %arg3: memref<2x8x1xf32, #tpu.memory_space<vmem>>, %arg4: memref<2x1x8xf32, #tpu.memory_space<vmem>>, %arg5: memref<2x8x8xf32, #tpu.memory_space<vmem>>) attributes {dimension_semantics = [#tpu.dimension_semantics<parallel>, #tpu.dimension_semantics<parallel>, #tpu.dimension_semantics<parallel>], iteration_bounds = array<i64: 1, 1, 1>, scalar_prefetch = 0 : i64, scratch_operands = 0 : i64, tpu.core_type = #tpu.core_type<tc>, window_params = [{transform_indices = @transform_0, window_bounds = array<i64: 2, 8, 1>}, {transform_indices = @transform_1, window_bounds = array<i64: 2, 1, 8>}, {transform_indices = @transform_2, window_bounds = array<i64: 2, 8, 8>}]} {
    %c0 = arith.constant 0 : index
    %c0_0 = arith.constant 0 : index
    %c0_1 = arith.constant 0 : index
    %0 = vector.load %arg3[%c0, %c0_0, %c0_1] : memref<2x8x1xf32, #tpu.memory_space<vmem>>, vector<2x8x1xf32>
    %c0_2 = arith.constant 0 : index
    %c0_3 = arith.constant 0 : index
    %c0_4 = arith.constant 0 : index
    %1 = vector.load %arg4[%c0_2, %c0_3, %c0_4] : memref<2x1x8xf32, #tpu.memory_space<vmem>>, vector<2x1x8xf32>
    %2 = vector.broadcast %0 : vector<2x8x1xf32> to vector<2x8x8xf32>
    %3 = vector.broadcast %1 : vector<2x1x8xf32> to vector<2x8x8xf32>
    %4 = arith.addf %2, %3 : vector<2x8x8xf32>
    %c0_5 = arith.constant 0 : index
    %c0_6 = arith.constant 0 : index
    %c0_7 = arith.constant 0 : index
    %5 = vector.load %arg5[%c0_5, %c0_6, %c0_7] : memref<2x8x8xf32, #tpu.memory_space<vmem>>, vector<2x8x8xf32>
    tpu.vector_store %arg5[%c0_5, %c0_6, %c0_7], %4 {strides = array<i32>} : memref<2x8x8xf32, #tpu.memory_space<vmem>>, vector<2x8x8xf32>,
    return
  }
  func.func @transform_0(%arg0: i32, %arg1: i32, %arg2: i32) -> (i32, i32, i32) {
    %c0_i32 = arith.constant 0 : i32
    %c0_i32_0 = arith.constant 0 : i32
    return %arg0, %arg1, %c0_i32 : i32, i32, i32
  }
  func.func @transform_1(%arg0: i32, %arg1: i32, %arg2: i32) -> (i32, i32, i32) {
    %c0_i32 = arith.constant 0 : i32
    %c0_i32_0 = arith.constant 0 : i32
    return %arg0, %c0_i32, %arg2 : i32, i32, i32
  }
  func.func @transform_2(%arg0: i32, %arg1: i32, %arg2: i32) -> (i32, i32, i32) {
    %c0_i32 = arith.constant 0 : i32
    return %arg0, %arg1, %arg2 : i32, i32, i32
  }
}

</mosaic_0001>

<bundles_post_ra>
// kernel: tpu_custom_call.1
= control target key start
LH: loop header
LB: loop body
LE: loop exit
PB: predicated region body
PF: predicated region fallthrough
CT: control target
= control target key end

     0   :  { %v88_v1 = vmov 0   ;;  %s122_s0 = inlined_call_operand.vmem [shape: f32[2,8,1], index: 0, kind: input, shape index: {}]   ;;  %s123_s1 = inlined_call_operand.vmem [shape: f32[2,1,8], index: 1, kind: input, shape index: {}]   ;;  %s124_s2 = inlined_call_operand.hbm [shape: f32[2,8,8], index: 2, kind: output, shape index: {}]  }
   0x1   :  { %v12_v0 = vld [vmem:[%s122_s0] sm:$0xff]  ;;  %59 = vset.pattern.permute.xlu0 %v88_v1 }
   0x2   :  { %7 = vsyncpa [#allocation3], 0  ;;  %18 = vperm.xlu0 %59, %v12_v0   ;;  %v13_v2 = vld [vmem:[%s122_s0 + $0x8] sm:$0xff]  ;;  %v60_v3 = vld [vmem:[%s123_s1] ss:$0 sm:$0xff]  ;;  %vm34_vm0 = vcmask 64512  }
   0x3   :  { %v61_v6 = vld [vmem:[%s123_s1 + $0x1] ss:$0 sm:$0xff]  ;;  %s89_s17 = smov [#allocation2]   ;;  %s43_s21 = sshll.u32 %s124_s2, 4  ;;  %s44_s21 = int_to_ptr.hbm [resolvable:$true] %s43_s21 }
   0x4   :  { %s41_s18 = sshll.u32 %s89_s17, 4  ;;  %s90_s0 = smov 128   ;;  %s42_s18 = int_to_ptr.vmem [resolvable:$true] %s41_s18 }
   0x5   :  { %s91_s22 = smov 8  }
   0xa   :  { %23 = vperm.xlu0 %59, %v13_v2  }
  0x74   :  { %v19_v4 = vpop.permute.xlu0 %18 }
  0x75   :  { %v32_v5 = vadd.f32 %v60_v3, %v19_v4 }
  0x77   :  { %35 = vst.msk [vmem:[#allocation2] sm:$0xff] %vm34_vm0, %v32_v5 }
  0x7c   :  { %v24_v7 = vpop.permute.xlu0 %23 }
  0x7d   :  { %v33_v8 = vadd.f32 %v61_v6, %v24_v7 }
  0x7f   :  { %36 = vst.msk [vmem:[#allocation2 + $0x8] sm:$0xff] %vm34_vm0, %v33_v8 }
  0x80   :  { %49 = dma.vmem_to_hbm [thread:$0]  %s42_s18, 256, %s44_s21, [#allocation3], %s90_s0, %s90_s0, %s91_s22  }
  0x81   :  { %86 = dma.done.wait [#allocation3], 256  }
  0x82   :  { %87 = vsyncadd [#allocation3], 4294967040 }
  0x83   :  { %54 = vsyncpa [#allocation3], 1 }

</bundles_post_ra>
